<compile_context>
chip_gen: v5e
topology: v5e:2x2
jax: 0.10.0
libtpu: 0.0.40
codegen_flags: <defaults>
</compile_context>

<pallas_src>
import functools

import jax
import jax.numpy as jnp
from jax.experimental import pallas as pl
from jax.experimental.pallas import tpu as pltpu

_LANE = 128
_MAX_HW_TILE = 8192                    # lanes per split-path tile (lane-dense)
_TARGET_GRID_STEPS = 8                 # prefer several grid steps if blocks stay big
_MIN_STEP_BYTES = 4 * 1024 * 1024      # keep per-step traffic >= ~4 MiB
_B1_SPLIT_MIN_BYTES = 8 * 1024 * 1024  # B==1 maps this big use split on 2-TC parts


@functools.lru_cache(maxsize=None)
def _vmem_budgets():
    """Returns (vmem_capacity, block_budget, vmem_limit), generation aware."""
    cap = 0
    try:
        cap = int(getattr(pltpu.get_tpu_info(), "vmem_capacity_bytes", 0) or 0)
    except Exception:
        cap = 0
    if cap >= 96 * 1024 * 1024:        # v5e / v6e: 128 MiB physical VMEM
        return cap, 72 * 1024 * 1024, 100 * 1024 * 1024
    # v7x (64 MiB physical) or unknown generation: stay conservative.
    return cap, 24 * 1024 * 1024, 46 * 1024 * 1024


def _partial_lane_sums(x):
    """(bt, C, n*128) -> (bt, C, 128) f32 partial sums.

    Lane-aligned static slices + VPU adds only; the single cross-lane (XLU)
    reduce is deferred to once per image so the pooling pass stays HBM-bound.
    """
    n = x.shape[-1] // _LANE
    acc = x[..., :_LANE].astype(jnp.float32)
    for j in range(1, n):
        acc = acc + x[..., j * _LANE:(j + 1) * _LANE].astype(jnp.float32)
    return acc


def _gate_from_pooled(pooled, w1t_ref, b1_ref, w2t_ref, b2_ref):
    """Tiny squeeze-excite MLP: (bt, C) raw sums -> (bt, C) sigmoid gate.

    w1t is pre-scaled by 1/HW in the wrapper, so `pooled` is the raw sum.
    """
    h = jnp.maximum(
        jnp.dot(pooled, w1t_ref[...], preferred_element_type=jnp.float32)
        + b1_ref[...], 0.0)
    return jax.nn.sigmoid(
        jnp.dot(h, w2t_ref[...], preferred_element_type=jnp.float32)
        + b2_ref[...])


def _fused_kernel(x_ref, w1t_ref, b1_ref, w2t_ref, b2_ref, o_ref):
    # Whole images per grid step: pool -> gate -> rescale (2 HBM passes).
    x = x_ref[...]                                          # (bt, C, HW)
    if x.shape[-1] % _LANE == 0:
        pooled = jnp.sum(_partial_lane_sums(x), axis=2)     # (bt, C) f32
    else:
        pooled = jnp.sum(x, axis=2, dtype=jnp.float32)
    g = _gate_from_pooled(pooled, w1t_ref, b1_ref, w2t_ref, b2_ref)
    o_ref[...] = x * g.astype(x.dtype)[:, :, None]


def _pool_kernel(x_ref, part_ref, acc_ref, *, hw, need_mask):
    # Split path pass 1: HW-tiled pooling into tiny per-(batch, split) sums.
    s = pl.program_id(1)
    h = pl.program_id(2)
    n_hw = pl.num_programs(2)

    @pl.when(h == 0)
    def _():
        acc_ref[...] = jnp.zeros_like(acc_ref)

    x = x_ref[...]                                          # (bt, C, thw)
    thw = x.shape[-1]
    if need_mask:
        # Ragged last tile / clamped duplicate tiles: zero out-of-range lanes.
        start = (s * n_hw + h) * thw
        pos = start + jax.lax.broadcasted_iota(jnp.int32, (1, 1, thw), 2)
        x = jnp.where(pos < hw, x, 0)
    acc_ref[...] += _partial_lane_sums(x)                   # (bt, C, 128), VPU only

    @pl.when(h == n_hw - 1)
    def _():
        reduced = jnp.sum(acc_ref[...], axis=2)             # (bt, C): one XLU reduce
        bt, c = reduced.shape
        row = jax.lax.broadcasted_iota(jnp.int32, (bt, 8, c), 1)
        part_ref[...] = jnp.where(row == 0, reduced[:, None, :], 0.0)


def _rescale_kernel(part_ref, w1t_ref, b1_ref, w2t_ref, b2_ref, x_ref, o_ref):
    # Split path pass 2: lane-dense rescale.  The tiny gate MLP is recomputed
    # per step from the resident partial sums (negligible FLOPs), which keeps
    # both grid axes "parallel" so v7x's two TensorCores share the work.
    pooled = jnp.sum(part_ref[...], axis=1)                 # (bt, C) f32
    g = _gate_from_pooled(pooled, w1t_ref, b1_ref, w2t_ref, b2_ref)
    x = x_ref[...]
    o_ref[...] = x * g.astype(x.dtype)[:, :, None]


def ca_layer(x, w1, b1, w2, b2, *, force_split=False, hw_tile=None):
    """Channel attention.

    x: (B, C, H, W); w1: (Cr, C); b1: (Cr,); w2: (C, Cr); b2: (C,).
    """
    B, C, H, W = x.shape
    HW = H * W
    Cr = w1.shape[0]
    itemsize = jnp.dtype(x.dtype).itemsize
    inv_hw = 1.0 / float(HW)

    vmem_cap, block_budget, vmem_limit = _vmem_budgets()
    two_tc = 0 < vmem_cap <= 64 * 1024 * 1024        # v7x-like: 2 TensorCores

    x2 = x.reshape(B, C, HW)
    # Fold the 1/HW of the average pool into the first 1x1-conv weight.
    w1t = jnp.transpose(w1).astype(jnp.float32) * inv_hw    # (C, Cr)
    w2t = jnp.transpose(w2).astype(jnp.float32)             # (Cr, C)
    b1r = b1.astype(jnp.float32).reshape(1, Cr)
    b2r = b2.astype(jnp.float32).reshape(1, C)

    weight_specs = [
        pl.BlockSpec((C, Cr), lambda *_: (0, 0)),
        pl.BlockSpec((1, Cr), lambda *_: (0, 0)),
        pl.BlockSpec((Cr, C), lambda *_: (0, 0)),
        pl.BlockSpec((1, C), lambda *_: (0, 0)),
    ]

    io_per_image = 2 * C * HW * itemsize             # in + out, single buffer
    fits_fused = 2 * io_per_image <= block_budget    # double-buffered blocks
    use_split = (force_split or not fits_fused) and HW >= _LANE
    if (not use_split) and two_tc and B == 1 and HW >= _LANE \
            and C * HW * itemsize >= _B1_SPLIT_MIN_BYTES:
        # B == 1 on a 2-TC part: the split path lets both cores work.
        use_split = True

    if not use_split:
        # ---- Fused single-pass path (feature map fits VMEM) ----
        max_bt = max(1, block_budget // (2 * io_per_image))
        bt = min(B, max_bt)
        if B >= 2:
            bt = min(bt, B // 2)                     # >= 2 parallel grid steps
        steps_bt = max(1, B // _TARGET_GRID_STEPS)
        if steps_bt < bt and steps_bt * io_per_image >= _MIN_STEP_BYTES:
            bt = steps_bt
        while B % bt:
            bt -= 1

        out = pl.pallas_call(
            _fused_kernel,
            out_shape=jax.ShapeDtypeStruct((B, C, HW), x.dtype),
            grid_spec=pltpu.PrefetchScalarGridSpec(
                num_scalar_prefetch=0,
                grid=(B // bt,),
                in_specs=[pl.BlockSpec((bt, C, HW), lambda bi: (bi, 0, 0))]
                         + weight_specs,
                out_specs=pl.BlockSpec((bt, C, HW), lambda bi: (bi, 0, 0)),
            ),
            compiler_params=pltpu.CompilerParams(
                dimension_semantics=("parallel",),
                vmem_limit_bytes=vmem_limit,
            ),
        )(x2, w1t, b1r, w2t, b2r)
        return out.reshape(B, C, H, W)

    # ---- Split path: (1) pooling partial sums, (2) lane-dense rescale ----
    if hw_tile is not None:
        thw = max(_LANE, (int(hw_tile) // _LANE) * _LANE)
    else:
        max_thw = max(_LANE, (block_budget // (4 * C * itemsize)) // _LANE * _LANE)
        thw = min(_MAX_HW_TILE, max_thw)
    thw = min(thw, max(_LANE, (HW // _LANE) * _LANE))   # keep thw <= HW (HW >= 128)
    total_tiles = pl.cdiv(HW, thw)

    bt = 1
    if B >= 2:
        max_bt = max(1, block_budget // (4 * C * thw * itemsize))
        bt = max(1, min(B // 2, max_bt))             # keep >= 2 parallel batch steps
        while B % bt:
            bt -= 1

    n_split = 2 if (B == 1 and total_tiles >= 2) else 1
    n_hw = pl.cdiv(total_tiles, n_split)
    need_mask = (HW % thw != 0) or (n_split * n_hw != total_tiles)

    if n_split > 1:
        def x_pool_map(bi, s, h):
            # Clamp to a valid tile; clamped duplicates are masked to zero.
            return (bi, 0, jnp.minimum(s * n_hw + h, total_tiles - 1))
    else:
        def x_pool_map(bi, s, h):
            return (bi, 0, h)

    partials = pl.pallas_call(
        functools.partial(_pool_kernel, hw=HW, need_mask=need_mask),
        out_shape=jax.ShapeDtypeStruct((B, 8 * n_split, C), jnp.float32),
        grid_spec=pltpu.PrefetchScalarGridSpec(
            num_scalar_prefetch=0,
            grid=(B // bt, n_split, n_hw),
            in_specs=[pl.BlockSpec((bt, C, thw), x_pool_map)],
            out_specs=pl.BlockSpec((bt, 8, C), lambda bi, s, h: (bi, s, 0)),
            scratch_shapes=[pltpu.VMEM((bt, C, _LANE), jnp.float32)],
        ),
        compiler_params=pltpu.CompilerParams(
            dimension_semantics=("parallel", "parallel", "arbitrary"),
            vmem_limit_bytes=vmem_limit,
        ),
    )(x2)

    out = pl.pallas_call(
        _rescale_kernel,
        out_shape=jax.ShapeDtypeStruct((B, C, HW), x.dtype),
        grid_spec=pltpu.PrefetchScalarGridSpec(
            num_scalar_prefetch=0,
            grid=(B // bt, total_tiles),
            in_specs=[pl.BlockSpec((bt, 8 * n_split, C), lambda bi, hi: (bi, 0, 0))]
                     + weight_specs
                     + [pl.BlockSpec((bt, C, thw), lambda bi, hi: (bi, 0, hi))],
            out_specs=pl.BlockSpec((bt, C, thw), lambda bi, hi: (bi, 0, hi)),
        ),
        compiler_params=pltpu.CompilerParams(
            dimension_semantics=("parallel", "parallel"),
            vmem_limit_bytes=vmem_limit,
        ),
    )(partials, w1t, b1r, w2t, b2r, x2)

    return out.reshape(B, C, H, W)


def ca_layer_ref(x, w1, b1, w2, b2):
    # Pure-JAX reference of the PyTorch forward.
    pooled = jnp.mean(x, axis=(2, 3))                  # (B, C)
    h = jnp.maximum(pooled @ w1.T + b1, 0.0)           # (B, Cr)
    g = jax.nn.sigmoid(h @ w2.T + b2)                  # (B, C)
    return x * g[:, :, None, None]


if __name__ == "__main__":
    B, C, H, W = 2, 32, 16, 16
    reduction = 16
    Cr = C // reduction

    key = jax.random.PRNGKey(0)
    kx, k1, k2, k3, k4 = jax.random.split(key, 5)

    x = jax.random.normal(kx, (B, C, H, W), dtype=jnp.float32)
    w1 = jax.random.normal(k1, (Cr, C), dtype=jnp.float32) * 0.1   # conv1 weight (out,in)
    b1 = jax.random.normal(k2, (Cr,), dtype=jnp.float32) * 0.1     # conv1 bias
    w2 = jax.random.normal(k3, (C, Cr), dtype=jnp.float32) * 0.1   # conv2 weight (out,in)
    b2 = jax.random.normal(k4, (C,), dtype=jnp.float32) * 0.1      # conv2 bias

    # Fused single-pass path (small feature map).
    out = ca_layer(x, w1, b1, w2, b2)
    jax.block_until_ready(out)
    ref = ca_layer_ref(x, w1, b1, w2, b2)
    assert out.shape == (B, C, H, W)
    assert jnp.allclose(out, ref, atol=1e-5, rtol=1e-5)

    # Split path on a non-128-multiple spatial size (ragged last HW tile,
    # in-kernel masking, no host-side pad/slice).
    x_odd = jax.random.normal(kx, (B, C, 15, 20), dtype=jnp.float32)
    out_odd = ca_layer(x_odd, w1, b1, w2, b2, force_split=True, hw_tile=128)
    jax.block_until_ready(out_odd)
    ref_odd = ca_layer_ref(x_odd, w1, b1, w2, b2)
    assert out_odd.shape == x_odd.shape
    assert jnp.allclose(out_odd, ref_odd, atol=1e-5, rtol=1e-5)

    # Split path with B == 1: exercises the 2-way HW-parallel pooling split
    # (partial sums + clamped/masked duplicate tile).
    x_b1 = jax.random.normal(k1, (1, C, 15, 20), dtype=jnp.float32)
    out_b1 = ca_layer(x_b1, w1, b1, w2, b2, force_split=True, hw_tile=128)
    jax.block_until_ready(out_b1)
    ref_b1 = ca_layer_ref(x_b1, w1, b1, w2, b2)
    assert out_b1.shape == x_b1.shape
    assert jnp.allclose(out_b1, ref_b1, atol=1e-5, rtol=1e-5)

    print("KERNEL_OK")
</pallas_src>

<mosaic_0001>
module attributes {stable_mosaic.version = 11 : i64} {
  func.func @_fused_kernel(%arg0: i32, %arg1: memref<1x32x256xf32, #tpu.memory_space<vmem>>, %arg2: memref<32x2xf32, #tpu.memory_space<vmem>>, %arg3: memref<1x2xf32, #tpu.memory_space<vmem>>, %arg4: memref<2x32xf32, #tpu.memory_space<vmem>>, %arg5: memref<1x32xf32, #tpu.memory_space<vmem>>, %arg6: memref<1x32x256xf32, #tpu.memory_space<vmem>>) attributes {dimension_semantics = [#tpu.dimension_semantics<parallel>], iteration_bounds = array<i64: 2>, scalar_prefetch = 0 : i64, scratch_operands = 0 : i64, tpu.core_type = #tpu.core_type<tc>, window_params = [{transform_indices = @transform_0, window_bounds = array<i64: 1, 32, 256>}, {pipeline_mode = #tpu.pipeline_mode<synchronous>, transform_indices = @transform_1, window_bounds = array<i64: 32, 2>}, {pipeline_mode = #tpu.pipeline_mode<synchronous>, transform_indices = @transform_2, window_bounds = array<i64: 1, 2>}, {pipeline_mode = #tpu.pipeline_mode<synchronous>, transform_indices = @transform_3, window_bounds = array<i64: 2, 32>}, {pipeline_mode = #tpu.pipeline_mode<synchronous>, transform_indices = @transform_4, window_bounds = array<i64: 1, 32>}, {transform_indices = @transform_5, window_bounds = array<i64: 1, 32, 256>}]} {
    %c0 = arith.constant 0 : index
    %c0_0 = arith.constant 0 : index
    %c0_1 = arith.constant 0 : index
    %0 = vector.load %arg1[%c0, %c0_0, %c0_1] : memref<1x32x256xf32, #tpu.memory_space<vmem>>, vector<1x32x256xf32>
    %1 = vector.extract_strided_slice %0 {offsets = [0, 0, 0], sizes = [1, 32, 128], strides = [1, 1, 1]} : vector<1x32x256xf32> to vector<1x32x128xf32>
    %2 = vector.extract_strided_slice %0 {offsets = [0, 0, 128], sizes = [1, 32, 128], strides = [1, 1, 1]} : vector<1x32x256xf32> to vector<1x32x128xf32>
    %3 = arith.addf %1, %2 : vector<1x32x128xf32>
    %cst = arith.constant dense<0.000000e+00> : vector<1x32xf32>
    %4 = vector.multi_reduction <add>, %3, %cst [2] : vector<1x32x128xf32> to vector<1x32xf32>
    %c0_2 = arith.constant 0 : index
    %c0_3 = arith.constant 0 : index
    %5 = vector.load %arg2[%c0_2, %c0_3] : memref<32x2xf32, #tpu.memory_space<vmem>>, vector<32x2xf32>
    %cst_4 = arith.constant dense<0.000000e+00> : vector<1x2xf32>
    %6 = tpu.matmul %4, %5, %cst_4 {dimension_numbers = #tpu.dot_dimension_numbers<[1], [0], [0], [1], [0, 0, 1, 1], [], []>} : vector<1x32xf32>, vector<32x2xf32>, vector<1x2xf32> -> vector<1x2xf32>
    %c0_5 = arith.constant 0 : index
    %c0_6 = arith.constant 0 : index
    %7 = vector.load %arg3[%c0_5, %c0_6] : memref<1x2xf32, #tpu.memory_space<vmem>>, vector<1x2xf32>
    %8 = arith.addf %6, %7 : vector<1x2xf32>
    %cst_7 = arith.constant 0.000000e+00 : f32
    %9 = vector.broadcast %cst_7 : f32 to vector<1x2xf32>
    %10 = arith.maximumf %8, %9 : vector<1x2xf32>
    %c0_8 = arith.constant 0 : index
    %c0_9 = arith.constant 0 : index
    %11 = vector.load %arg4[%c0_8, %c0_9] : memref<2x32xf32, #tpu.memory_space<vmem>>, vector<2x32xf32>
    %cst_10 = arith.constant dense<0.000000e+00> : vector<1x32xf32>
    %12 = tpu.matmul %10, %11, %cst_10 {dimension_numbers = #tpu.dot_dimension_numbers<[1], [0], [0], [1], [0, 0, 1, 1], [], []>} : vector<1x2xf32>, vector<2x32xf32>, vector<1x32xf32> -> vector<1x32xf32>
    %c0_11 = arith.constant 0 : index
    %c0_12 = arith.constant 0 : index
    %13 = vector.load %arg5[%c0_11, %c0_12] : memref<1x32xf32, #tpu.memory_space<vmem>>, vector<1x32xf32>
    %14 = arith.addf %12, %13 : vector<1x32xf32>
    %15 = arith.negf %14 : vector<1x32xf32>
    %16 = math.exp %15 : vector<1x32xf32>
    %cst_13 = arith.constant 1.000000e+00 : f32
    %17 = vector.broadcast %cst_13 : f32 to vector<1x32xf32>
    %18 = arith.addf %17, %16 : vector<1x32xf32>
    %19 = arith.divf %17, %18 : vector<1x32xf32>
    %20 = vector.shape_cast %19 : vector<1x32xf32> to vector<1x32x1xf32>
    %21 = vector.broadcast %20 : vector<1x32x1xf32> to vector<1x32x256xf32>
    %22 = arith.mulf %0, %21 : vector<1x32x256xf32>
    %c0_14 = arith.constant 0 : index
    %c0_15 = arith.constant 0 : index
    %c0_16 = arith.constant 0 : index
    %23 = vector.load %arg6[%c0_14, %c0_15, %c0_16] : memref<1x32x256xf32, #tpu.memory_space<vmem>>, vector<1x32x256xf32>
    tpu.vector_store %arg6[%c0_14, %c0_15, %c0_16], %22 {strides = array<i32>} : memref<1x32x256xf32, #tpu.memory_space<vmem>>, vector<1x32x256xf32>,
    return
  }
  func.func @transform_0(%arg0: i32) -> (i32, i32, i32) {
    %c0_i32 = arith.constant 0 : i32
    %c0_i32_0 = arith.constant 0 : i32
    %c0_i32_1 = arith.constant 0 : i32
    return %arg0, %c0_i32, %c0_i32_0 : i32, i32, i32
  }
  func.func @transform_1(%arg0: i32) -> (i32, i32) {
    %c0_i32 = arith.constant 0 : i32
    %c0_i32_0 = arith.constant 0 : i32
    %c0_i32_1 = arith.constant 0 : i32
    return %c0_i32, %c0_i32_0 : i32, i32
  }
  func.func @transform_2(%arg0: i32) -> (i32, i32) {
    %c0_i32 = arith.constant 0 : i32
    %c0_i32_0 = arith.constant 0 : i32
    %c0_i32_1 = arith.constant 0 : i32
    return %c0_i32, %c0_i32_0 : i32, i32
  }
  func.func @transform_3(%arg0: i32) -> (i32, i32) {
    %c0_i32 = arith.constant 0 : i32
    %c0_i32_0 = arith.constant 0 : i32
    %c0_i32_1 = arith.constant 0 : i32
    return %c0_i32, %c0_i32_0 : i32, i32
  }
  func.func @transform_4(%arg0: i32) -> (i32, i32) {
    %c0_i32 = arith.constant 0 : i32
    %c0_i32_0 = arith.constant 0 : i32
    %c0_i32_1 = arith.constant 0 : i32
    return %c0_i32, %c0_i32_0 : i32, i32
  }
  func.func @transform_5(%arg0: i32) -> (i32, i32, i32) {
    %c0_i32 = arith.constant 0 : i32
    %c0_i32_0 = arith.constant 0 : i32
    %c0_i32_1 = arith.constant 0 : i32
    return %arg0, %c0_i32, %c0_i32_0 : i32, i32, i32
  }
}

</mosaic_0001>

<bundles_post_ra>
// kernel: tpu_custom_call.1
= control target key start
LH: loop header
LB: loop body
LE: loop exit
PB: predicated region body
PF: predicated region fallthrough
CT: control target
= control target key end

     0   :  { %10 = vsyncpa [#allocation3], 0  ;;  %s887_s0 = inlined_call_operand.hbm [shape: f32[2,32,256], index: 0, kind: input, shape index: {}]   ;;  %s888_s1 = inlined_call_operand.vmem [shape: f32[32,2], index: 1, kind: input, shape index: {}]   ;;  %s889_s2 = inlined_call_operand.vmem [shape: f32[1,2], index: 2, kind: input, shape index: {}]   ;;  %s890_s3 = inlined_call_operand.vmem [shape: f32[2,32], index: 3, kind: input, shape index: {}]   ;;  %s891_s4 = inlined_call_operand.vmem [shape: f32[1,32], index: 4, kind: input, shape index: {}]   ;;  %s892_s5 = inlined_call_operand.hbm [shape: f32[2,32,256], index: 5, kind: output, shape index: {}]  }
   0x1   :  { %12 = vsyncpa [#allocation3 + $0x1], 0 }
   0x2   :  { %13 = vsyncpa [#allocation4], 0 }
   0x3   :  { %15 = vsyncpa [#allocation4 + $0x1], 0  ;;  %s703_s18 = smov 0   ;;  %s705_s19 = smov 0  }
   0x4   :  { %s707_s20 = smov 0   ;;  %s709_s21 = smov 0  }
   0x5 LB: > { %s724_s22 = sadd.s32 4294967295, %s667_s21   ;;  %s492_s23 = sadd.s32 4294967294, %s667_s21   ;;  %s667_s21 = sphi %s709_s21, %s902_s21   ;;  %s663_s20 = sphi %s707_s20, %s901_s20   ;;  %s659_s19 = sphi %s705_s19, %s900_s19   ;;  %s655_s18 = sphi %s703_s18, %s899_s18  }
   0x6   : > { %s728_s24 = sadd.s32 1, %s667_s21   ;;  %s28_s25 = sadd.s32 1, %s663_s20 }
   0x7   : > { %s25_s26 = ssub.s32 %s667_s21, %s728_s24  ;;  %p35_p0 = scmp.ne.s32.totalorder %s663_s20, %s659_s19 }
   0x8   : > { %p26_p1 = scmp.eq.s32.totalorder %s25_s26, 0  ;;  %p36_p2 = scmp.eq.s32.totalorder %s667_s21, 0 }
   0x9   : > { %p41_p3 = scmp.ne.s32.totalorder %s659_s19, %s655_s18  ;;  %p42_p4 = scmp.eq.s32.totalorder %s724_s22, 0 }
   0xa   : > { %s740_s27 = scalar_select %p26_p1, %s663_s20, %s28_s25  }
   0xb   : > { %p742_p5 = por %p36_p2, %p35_p0  ;;  %p746_p6 = por %p42_p4, %p41_p3 }
   0xc   : > { %p149_p7 = scmp.eq.s32.totalorder %s724_s22, 1  ;;  %p155_p8 = scmp.eq.s32.totalorder %s492_s23, 1 }
   0xd   : > { %p524_p10 = scmp.lt.s32.totalorder %s667_s21, 2  ;;  %s187_s7 = sand.u32 1, %s663_s20  }
   0xe   : > { %p753_p11 = por %p149_p7, %p35_p0  ;;  %p757_p12 = por %p155_p8, %p41_p3 }
   0xf   : > { %s510_s8 = sshll.u32 %s667_s21, 6  ;;  %s495_s9 = sshll.u32 %s187_s7, 6 }
  0x10   : > { %s196_s12 = scalar_lea.hbm %s887_s0, %s510_s8  ;;  %s191_s14 = scalar_lea.vmem [#allocation2], %s495_s9 }
  0x11   : > { %s197_s13 = sshll.u32 %s196_s12, 4  ;;  %s199_s15 = sshll.u32 %s191_s14, 4  ;;  %s198_s13 = int_to_ptr.hbm [resolvable:$true] %s197_s13  ;;  %s200_s15 = int_to_ptr.vmem [resolvable:$true] %s199_s15 }
  0x12   : > { %p768_p13 = pnand %p524_p10, %p742_p5  ;;  %p498_p0 = scmp.ge.s32.totalorder %s667_s21, 1 }
  0x13   : > { %p207_p1 = scmp.lt.s32.totalorder %s667_s21, 3  ;;  %s188_s17 = scalar_lea.sflag [#allocation3], %s187_s7 }
  0x14   : > { %s571_s23 = sshra.s32 %s198_s13, 4  ;;  %p575_p3 = pneg %p768_p13  ;;  %s572_s23 = int_to_ptr.hbm [resolvable:$true] %s571_s23 }
  0x15   : > { %s573_s25 = scalar_lea.hbm %s572_s23, 64  ;;  %s578_s28 = scalar_lea.hbm %s887_s0, 128 }
  0x16   : > { %p574_p2 = scmp.ne.s32.totalorder %s572_s23, %s573_s25  ;;  %p579_p5 = scmp.lt.s32.totalorder %s572_s23, %s887_s0 }
  0x17   : > { %p580_p8 = scmp.lt.s32.totalorder %s578_s28, %s573_s25 }
  0x18   : > { %p576_p4 = pnand %p575_p3, %p574_p2 }
  0x19   : > { %p581_p10 = por %p580_p8, %p579_p5 }
  0x1a   : > { %p577_p7 = pneg %p576_p4 }
  0x1c   : > { %p582_p9 = pnand %p581_p10, %p577_p7 }
  0x1e   : > { %585 = shalt.err (!%p582_p9)
}
  0x1f   : > { %s669_s7 = smov 256   ;;  %s670_s11 = smov 16  }
  0x20   : > { %519 = dma.hbm_to_vmem [thread:$0]  (!%p768_p13), %s198_s13, 1024, %s200_s15, %s188_s17, %s669_s7, %s669_s7, %s670_s11  }
  0x21   : > { %p208_p2 = pnand %p498_p0, %p207_p1 }
  0x22   : > { %s789_s12 = sand.u32 (!%p208_p2), 1, %s659_s19  }
  0x23   : > { %211 = sbr.rel (%p208_p2) target bundleno = 585 (0x249), region = 40  ;;  %s499_s14 = sshll.u32 (!%p208_p2), %s789_s12, 6 }
  0x24   : > { %s214_s23 = scalar_lea.sflag (!%p208_p2), [#allocation3], %s789_s12  ;;  %s217_s25 = scalar_lea.vmem (!%p208_p2), [#allocation2], %s499_s14 }
  0x28   : > { %646 = dma.done.wait (%p746_p6), %s214_s23, 1024  }
  0x29   : > { %648 = vsyncadd (%p746_p6), %s214_s23, 4294966272  ;;  %v799_v0 = vld [vmem:[%s217_s25] sm:$0xff]  ;;  %v801_v1 = vld [vmem:[%s217_s25 + $0x8] sm:$0xff]  ;;  %v274_v16 = vlaneseq  ;;  %vm279_vm0 = vcmask 130112   ;;  %vm283_vm1 = vcmask 195712   ;;  %vm287_vm2 = vcmask 261312  }
  0x2a   : > { %v803_v2 = vld [vmem:[%s217_s25 + $0x20] sm:$0xff]  ;;  %v253_v3 = vadd.f32 %v801_v1, %v799_v0  ;;  %v807_v4 = vld [vmem:[%s217_s25 + $0x28] sm:$0xff]  ;;  %v811_v6 = vld [vmem:[%s217_s25 + $0x10] sm:$0xff]  ;;  %vm289_vm3 = vcmask 261120   ;;  %vm319_vm4 = vcmask 1041408   ;;  %vm315_vm5 = vcmask 15360  }
  0x2b   : > { %v255_v5 = vadd.f32 %v807_v4, %v803_v2  ;;  %v813_v7 = vld [vmem:[%s217_s25 + $0x18] sm:$0xff]  ;;  %v815_v8 = vld [vmem:[%s217_s25 + $0x30] sm:$0xff]  ;;  %v266_v14 = vld [vmem:[%s888_s1 + $0x8] sm:$0xff]  ;;  %v275_v19 = vand.u32 127, %v274_v16  ;;  %v364_v37 = vshrl.u32 %v274_v16, 7  ;;  %s244_s29 = scalar_lea.vmem [#allocation5], %s499_s14 }
  0x2c   : > { %257 = vadd.xlane.f32.xlu0 %v253_v3  ;;  %v817_v9 = vld [vmem:[%s217_s25 + $0x38] sm:$0xff]  ;;  %v254_v10 = vadd.f32 %v813_v7, %v811_v6  ;;  %v267_v13 = vld [vmem:[%s888_s1 + $0x10] sm:$0xff]  ;;  %v265_v15 = vld [vmem:[%s888_s1] sm:$0xff]  ;;  %s511_s13 = sshll.u32 %s724_s22, 6  ;;  %s416_s26 = sshll.u32 %s244_s29, 4  ;;  %s417_s26 = int_to_ptr.vmem [resolvable:$true] %s416_s26 }
  0x2d   : > { %261 = vadd.xlane.f32.xlu1 %v255_v5  ;;  %v256_v11 = vadd.f32 %v817_v9, %v815_v8  ;;  %v268_v12 = vld [vmem:[%s888_s1 + $0x18] sm:$0xff]  ;;  %v277_v20 = vadd.s32 4294967288, %v275_v19  ;;  %v281_v21 = vadd.s32 4294967280, %v275_v19  ;;  %v285_v22 = vadd.s32 4294967272, %v275_v19  ;;  %v313_v32 = vld [vmem:[%s890_s3] sm:$0x3]  ;;  %562 = vset.pattern.permute.xlu2 %v364_v37  ;;  %s415_s17 = scalar_lea.hbm %s892_s5, %s511_s13 }
  0x2e   : > { %304 = vmatpush.msra.mxu0 %v268_v12  ;;  %502 = vmatpush.msk.msra.mxu1 %vm319_vm4, %v313_v32  ;;  %v269_v33 = vld [vmem:[%s889_s2] sm:$0x1]  ;;  %v383_v38 = vadd.s32 24, %v364_v37  ;;  %v377_v39 = vadd.s32 16, %v364_v37  ;;  %v371_v57 = vadd.s32 8, %v364_v37  ;;  %s418_s8 = sshll.u32 %s415_s17, 4  ;;  %s419_s8 = int_to_ptr.hbm [resolvable:$true] %s418_s8 }
  0x2f   : > { %v314_v40 = vld [vmem:[%s891_s4] sm:$0x1]  ;;  %s404_s22 = scalar_lea.sflag [#allocation4], %s789_s12  ;;  %s615_s14 = sshra.s32 %s419_s8, 4  ;;  %s616_s14 = int_to_ptr.hbm [resolvable:$true] %s615_s14 }
  0x30   : > { %305 = vmatpush.msra.mxu0 %v267_v13  ;;  %565 = vset.pattern.permute.xlu1 %v383_v38  ;;  %s617_s28 = scalar_lea.hbm %s616_s14, 64  ;;  %s621_s7 = scalar_lea.hbm %s892_s5, 128 }
  0x31   : > { %564 = vset.pattern.permute.xlu0 %v377_v39  ;;  %p618_p6 = scmp.ne.s32.totalorder %s616_s14, %s617_s28  ;;  %p622_p0 = scmp.lt.s32.totalorder %s616_s14, %s892_s5 }
  0x32   : > { %306 = vmatpush.msra.mxu0 %v266_v14  ;;  %p623_p1 = scmp.lt.s32.totalorder %s621_s7, %s617_s28 }
  0x33   : > { %p619_p9 = pnand %p618_p6, %p753_p11 }
  0x34   : > { %259 = vadd.xlane.f32.xlu0 %v254_v10  ;;  %307 = vmatpush.msra.mxu0 %v265_v15  ;;  %p624_p3 = por %p623_p1, %p622_p0 }
  0x35   : > { %263 = vadd.xlane.f32.xlu1 %v256_v11  ;;  %p620_p13 = pneg %p619_p9 }
  0x37   : > { %p625_p4 = pnand %p624_p3, %p620_p13 }
  0x9f   : > { %v258_v17 = vpop.xlane.xlu0 %257 }
  0xa0   : > { %v262_v18 = vpop.xlane.xlu1 %261  ;;  %v276_v24 = vperm.slane %v258_v17, %v275_v19 }
  0xa1   : > { %v282_v27 = vperm.slane %v262_v18, %v281_v21 }
  0xa7   : > { %v260_v23 = vpop.xlane.xlu0 %259 }
  0xa8   : > { %v278_v25 = vperm.slane %v260_v23, %v277_v20  ;;  %v264_v26 = vpop.xlane.xlu1 %263 }
  0xa9   : > { %v286_v28 = vperm.slane %v264_v26, %v285_v22 }
  0xaa   : > { %v280_v29 = vsel %vm279_vm0, %v278_v25, %v276_v24 }
  0xab   : > { %v284_v30 = vsel %vm283_vm1, %v282_v27, %v280_v29 }
  0xac   : > { %v288_v31 = vsel %vm287_vm2, %v286_v28, %v284_v30 }
  0xad   : > { %501 = vmatmul.msk.f32.vlgmr.msra.gmra.mxu0 %vm289_vm3, %v288_v31 }
 0x12a   : > { %v309_v34 = vpop.f32.mrf.mxu0 }
 0x12b   : > { %v310_v35 = vadd.f32 %v309_v34, %v269_v33 }
 0x12d   : > { %v312_v36 = vmax.f32 %v310_v35, 0.0 }
 0x12f   : > { %503 = vmatmul.msk.f32.vlgmr.msra.gmra.mxu1 %vm315_vm5, %v312_v36 }
 0x1ac   : > { %v340_v41 = vpop.f32.mrf.mxu1 }
 0x1ad   : > { %v341_v42 = vadd.f32 %v340_v41, %v314_v40 }
 0x1af   : > { %v504_v43 = vmul.f32 -1.442695, %v341_v42 }
 0x1b1   : > { %567 = vpow2.f32 %v504_v43 }
 0x1b7   : > { %v568_v44 = vpop.eup %567 }
 0x1b8   : > { %v346_v45 = vadd.f32 1.0, %v568_v44 }
 0x1ba   : > { %569 = vrcp.f32 %v346_v45  ;;  %v358_v49 = vand.u32 2147483648, %v346_v45  ;;  %v356_v51 = vand.u32 2147483647, %v346_v45  ;;  %vm352_vm7 = vweird.f32 %v346_v45 }
 0x1bc   : > { %v359_v53 = vor.u32 1.1754944e-38, %v358_v49  ;;  %vm357_vm9 = vcmp.eq.f32.partialorder %v356_v51, 8.507059e+37 }
 0x1c0   : > { %v570_v46 = vpop.eup %569 }
 0x1c1   : > { %v348_v47 = vmul.f32 %v570_v46, %v346_v45  ;;  %vm353_vm6 = vweird.f32 %v570_v46 }
 0x1c2   : > { %vm354_vm8 = vmor %vm352_vm7, %vm353_vm6 }
 0x1c3   : > { %v349_v48 = vsub.f32 1.0, %v348_v47 }
 0x1c5   : > { %v350_v50 = vmul.f32 %v570_v46, %v349_v48 }
 0x1c7   : > { %v351_v52 = vadd.f32 %v570_v46, %v350_v50 }
 0x1c9   : > { %v355_v54 = vsel %vm354_vm8, %v570_v46, %v351_v52 }
 0x1ca   : > { %v360_v55 = vsel %vm357_vm9, %v359_v53, %v355_v54 }
 0x1cb   : > { %v362_v56 = vperm.slane %v360_v55, 0 }
 0x1cd   : > { %385 = vperm.xlu1 %565, %v362_v56   ;;  %379 = vperm.xlu0 %564, %v362_v56  }
 0x1ce   : > { %367 = vperm.xlu2 %562, %v362_v56  }
 0x1d5   : > { %566 = vset.pattern.permute.xlu0 %v383_v38 }
 0x1d6   : > { %563 = vset.pattern.permute.xlu2 %v371_v57 }
 0x1de   : > { %373 = vperm.xlu2 %563, %v362_v56  }
 0x228   : > { %v368_v58 = vpop.permute.xlu2 %367 }
 0x229   : > { %v387_v59 = vmul.f32 %v368_v58, %v799_v0  ;;  %v388_v60 = vmul.f32 %v368_v58, %v801_v1 }
 0x22b   : > { %395 = vst [vmem:[%s244_s29] sm:$0xff] %v387_v59 }
 0x22c   : > { %396 = vst [vmem:[%s244_s29 + $0x8] sm:$0xff] %v388_v60 }
 0x238   : > { %v374_v61 = vpop.permute.xlu2 %373 }
 0x239   : > { %v389_v62 = vmul.f32 %v374_v61, %v811_v6  ;;  %v390_v63 = vmul.f32 %v374_v61, %v813_v7 }
 0x23b   : > { %397 = vst [vmem:[%s244_s29 + $0x10] sm:$0xff] %v389_v62 }
 0x23c   : > { %398 = vst [vmem:[%s244_s29 + $0x18] sm:$0xff] %v390_v63 }
 0x23f   : > { %v386_v0 = vpop.permute.xlu1 %385  ;;  %v380_v1 = vpop.permute.xlu0 %379 }
 0x240   : > { %v393_v3 = vmul.f32 %v386_v0, %v815_v8  ;;  %v394_v5 = vmul.f32 %v386_v0, %v817_v9  ;;  %v391_v6 = vmul.f32 %v380_v1, %v803_v2  ;;  %v392_v7 = vmul.f32 %v380_v1, %v807_v4 }
 0x242   : > { %401 = vst [vmem:[%s244_s29 + $0x30] sm:$0xff] %v393_v3 }
 0x243   : > { %402 = vst [vmem:[%s244_s29 + $0x38] sm:$0xff] %v394_v5 }
 0x244   : > { %399 = vst [vmem:[%s244_s29 + $0x20] sm:$0xff] %v391_v6 }
 0x245   : > { %400 = vst [vmem:[%s244_s29 + $0x28] sm:$0xff] %v392_v7 }
 0x246   : > { %628 = shalt.err (!%p625_p4)
}
 0x247   : > { %s671_s12 = smov 256   ;;  %s672_s25 = smov 16  }
 0x248   : > { %514 = dma.vmem_to_hbm [thread:$0]  (%p753_p11), %s417_s26, 1024, %s419_s8, %s404_s22, %s671_s12, %s671_s12, %s672_s25  }
 0x249 PF: > { %s433_s29 = sand.u32 1, %s655_s18   ;;  %p898_p7 = scmp.ge.s32.totalorder %s667_s21, 2 }
 0x24a   : > { %s434_s13 = scalar_lea.sflag [#allocation4], %s433_s29 }
 0x24b   : > { %p521_p5 = pnand %p898_p7, %p757_p12 }
 0x24d   : > { %p522_p8 = pneg %p521_p5 }
 0x24f   : > { %650 = dma.done.wait (%p522_p8), %s434_s13, 1024  }
 0x250   : > { %652 = vsyncadd (%p522_p8), %s434_s13, 4294966272  ;;  %p18_p10 = scmp.ge.s32.totalorder %s728_s24, 4   ;;  %s899_s18 = smov %s659_s19 }
 0x251   : > { %s900_s19 = smov %s663_s20  ;;  %s901_s20 = smov %s740_s27 }
 0x252   : > { %s902_s21 = smov %s728_s24  ;;  %20 = sbr.rel (!%p18_p10) target bundleno = 5 (0x5), region = 85 }
 0x257   :  { %440 = vsyncpa [#allocation3], 1 }
 0x258   :  { %442 = vsyncpa [#allocation3 + $0x1], 1 }
 0x259   :  { %443 = vsyncpa [#allocation4], 1 }
 0x25a   :  { %445 = vsyncpa [#allocation4 + $0x1], 1 }

</bundles_post_ra>
